<compile_context>
chip_gen: v6e
topology: v6e:2x2x1
jax: 0.10.0
libtpu: 0.0.40
codegen_flags: <defaults>
</compile_context>

<pallas_src>
import functools

import jax
import jax.numpy as jnp
from jax.experimental import pallas as pl
from jax.experimental.pallas import tpu as pltpu


def _round_up(x, m):
    return ((x + m - 1) // m) * m


def _cdiv(a, b):
    return (a + b - 1) // b


def _device_vmem_capacity_bytes():
    """Physical per-core VMEM; fall back to 64 MiB (smallest across v5e/v6e/v7x)."""
    try:
        cap = getattr(pltpu.get_tpu_info(), "vmem_capacity_bytes", None)
        if cap:
            return int(cap)
    except Exception:
        pass
    return 64 * 1024 * 1024


def _exp_dtype():
    """bf16 exponent on v6e/v7x (bf16 EUP); keep f32 elsewhere (v5e has no bf16 EUP)."""
    try:
        kind = jax.devices()[0].device_kind.lower()
        if ("v6" in kind) or ("v7" in kind):
            return jnp.bfloat16
    except Exception:
        pass
    return jnp.float32


def _vmem_limit_bytes(vmem_est, vmem_cap):
    headroom = 8 * 1024 * 1024
    hi = max(vmem_cap - headroom, 16 * 1024 * 1024)
    want = max(32 * 1024 * 1024, int(1.5 * vmem_est) + 4 * 1024 * 1024)
    return int(min(hi, want))


# ----------------------------------------------------------------------------------
# Kernels
# ----------------------------------------------------------------------------------
def _generator_kernel_single(x_ref, w_ref, b_ref, o_ref):
    # Whole vocab resident in one tile: fused linear + log_softmax, one pass.
    logits = jnp.dot(x_ref[...], w_ref[...], preferred_element_type=jnp.float32)
    logits = logits + b_ref[...]
    m = jnp.max(logits, axis=-1, keepdims=True)
    shifted = logits - m
    lse = jnp.log(jnp.sum(jnp.exp(shifted), axis=-1, keepdims=True))
    o_ref[...] = (shifted - lse).astype(o_ref.dtype)


def _logits_lse_kernel(x_ref, w_ref, b_ref, o_ref, lse_ref, m_sc, l_sc,
                       *, tn, vocab, exp_dtype):
    # grid = (vocab_tiles, m_tiles); vocab tile j OUTER (sequential online-LSE carry),
    # m tile i INNER so the weight block (0, j) stays VMEM-resident across all i.
    j = pl.program_id(0)
    i = pl.program_id(1)

    logits = jnp.dot(x_ref[...], w_ref[...], preferred_element_type=jnp.float32)
    logits = logits + b_ref[...]

    if vocab % tn != 0:
        # Mask padded columns of the (only possible) partial last vocab tile so they
        # never contribute to the row max / sum-exp.  Padded output columns are
        # dropped by the bounded writeback anyway.
        col = j * tn + jax.lax.broadcasted_iota(jnp.int32, logits.shape, 1)
        logits = jnp.where(col < vocab, logits, -jnp.inf)

    # Raw, unnormalized logits; the output-only fixup pass subtracts the LSE later.
    o_ref[...] = logits.astype(o_ref.dtype)

    tile_max = jnp.max(logits, axis=-1, keepdims=True)

    def _sum_exp(shifted):
        # bf16 exp on v6e/v7x (EUP has bf16); accumulation stays f32.
        return jnp.sum(jnp.exp(shifted.astype(exp_dtype)).astype(jnp.float32),
                       axis=-1, keepdims=True)

    @pl.when(j == 0)
    def _():
        # First vocab tile for these rows: overwrite -> no scratch-init pass needed
        # (also robust if the m axis is ever sharded across cores).
        m_sc[i] = tile_max
        l_sc[i] = _sum_exp(logits - tile_max)

    @pl.when(j > 0)
    def _():
        m_prev = m_sc[i]
        m_new = jnp.maximum(m_prev, tile_max)
        l_sc[i] = l_sc[i] * jnp.exp(m_prev - m_new) + _sum_exp(logits - m_new)
        m_sc[i] = m_new

    # Running LSE.  The lse block index (i, 0) is revisited once per vocab tile;
    # Pallas writes it back each visit but grid order is sequential, so only the
    # value written at the last vocab tile survives in HBM (and every intermediate
    # write is a fully-formed partial LSE, never garbage).
    lse_ref[...] = m_sc[i] + jnp.log(l_sc[i])


def _lse_fixup_kernel(o_in_ref, lse_ref, o_ref):
    # log_softmax = raw_logits - lse; aliased in place (input 0 == output 0).
    o_ref[...] = (o_in_ref[...].astype(jnp.float32) - lse_ref[...]).astype(o_ref.dtype)


# ----------------------------------------------------------------------------------
# Wrapper
# ----------------------------------------------------------------------------------
@functools.partial(jax.jit, static_argnames=("tm", "tn", "out_dtype"))
def generator_forward(x, weight, bias, *, tm=256, tn=2048, out_dtype=jnp.bfloat16):
    """Fused Linear(d_model -> vocab) + log_softmax.

    x: (..., d_model); weight: (d_model, vocab) -- transposed vs torch Linear storage,
    ideally pre-cast to bf16 once at init; bias: (vocab,).
    Returns (..., vocab) log-probabilities in `out_dtype` (bf16 by default).
    """
    orig_shape = x.shape
    d_model = int(orig_shape[-1])
    vocab = int(weight.shape[1])
    m_total = 1
    for s in orig_shape[:-1]:
        m_total *= int(s)

    x2d = x.reshape(m_total, d_model)

    # bf16 operands on the MXU; accumulation and softmax math stay f32.  If the weight
    # is already bf16 (cast once at init) no per-call cast / extra HBM stream happens.
    x_bf = x2d.astype(jnp.bfloat16)
    w_bf = weight if weight.dtype == jnp.bfloat16 else weight.astype(jnp.bfloat16)
    b2d = bias.reshape(1, vocab).astype(jnp.float32)

    vmem_cap = _device_vmem_capacity_bytes()
    out_bytes = jnp.dtype(out_dtype).itemsize

    # ---- tile sizes ---------------------------------------------------------------
    tm_eff = max(8, min(tm, _round_up(m_total, 8)))
    tm_eff = _round_up(tm_eff, 8)
    # Give a dual-TensorCore chip (v7x) at least two m tiles to shard on the parallel
    # paths; on single-core chips the extra grid step costs ~0.35us.
    if m_total >= 16 and _cdiv(m_total, tm_eff) < 2:
        tm_eff = max(8, _round_up(_cdiv(m_total, 2), 8))

    tn_eff = max(128, min(_round_up(tn, 128), _round_up(vocab, 128)))
    # Keep the double-buffered bf16 weight tile under ~1/3 of physical VMEM
    # (large d_model on v7x's 64 MiB would otherwise break pipelining).
    while tn_eff > 512 and 2 * d_model * tn_eff * 2 > vmem_cap // 3:
        tn_eff = max(128, _round_up(tn_eff // 2, 128))

    nm = _cdiv(m_total, tm_eff)
    nn = _cdiv(vocab, tn_eff)

    out_shape2d = jax.ShapeDtypeStruct((m_total, vocab), out_dtype)

    # ---- fast path: whole vocab fits one tile --------------------------------------
    if nn == 1:
        v_pad = _round_up(vocab, 128)
        vmem_est = (
            2 * tm_eff * d_model * 2          # x tile (bf16) x2 buffers
            + 2 * d_model * v_pad * 2         # weight (bf16), grid-invariant (<=2 bufs)
            + 2 * 8 * v_pad * 4               # bias (f32)
            + tm_eff * v_pad * 4              # f32 logits temporary
            + 2 * tm_eff * v_pad * max(out_bytes, 4)   # out tile x2 buffers
        )
        out = pl.pallas_call(
            _generator_kernel_single,
            out_shape=out_shape2d,
            grid_spec=pltpu.PrefetchScalarGridSpec(
                num_scalar_prefetch=0,
                grid=(nm,),
                in_specs=[
                    pl.BlockSpec((tm_eff, d_model), lambda i: (i, 0)),
                    # Grid-invariant index maps -> weight/bias DMA'd once and kept
                    # VMEM-resident across all m tiles (no re-fetch per tile).
                    pl.BlockSpec((d_model, vocab), lambda i: (0, 0)),
                    pl.BlockSpec((1, vocab), lambda i: (0, 0)),
                ],
                out_specs=pl.BlockSpec((tm_eff, vocab), lambda i: (i, 0)),
            ),
            compiler_params=pltpu.CompilerParams(
                dimension_semantics=("parallel",),
                vmem_limit_bytes=_vmem_limit_bytes(vmem_est, vmem_cap),
            ),
        )(x_bf, w_bf, b2d)
        return out.reshape(*orig_shape[:-1], vocab)

    # ---- tiled path: pass A (logits + online LSE) then pass B (output-only fixup) ---
    exp_dtype = _exp_dtype()

    vmem_est = (
        2 * tm_eff * d_model * 2              # x tile (bf16) x2 buffers
        + 2 * d_model * tn_eff * 2            # weight tile (bf16) x2 buffers
        + 2 * 8 * tn_eff * 4                  # bias tile (f32) x2 buffers
        + tm_eff * tn_eff * 4                 # f32 logits temporary
        + 2 * tm_eff * tn_eff * out_bytes     # raw-logits out tile x2 buffers
        + 2 * tm_eff * 128 * 4                # lse out tile x2 (lane-padded)
        + 2 * nm * tm_eff * 128 * 4           # running max / sum-exp scratch (lane-padded)
    )
    vmem_limit = _vmem_limit_bytes(vmem_est, vmem_cap)

    kernel_a = functools.partial(
        _logits_lse_kernel, tn=tn_eff, vocab=vocab, exp_dtype=exp_dtype)

    logits_raw, lse = pl.pallas_call(
        kernel_a,
        out_shape=(
            out_shape2d,                                        # raw logits
            jax.ShapeDtypeStruct((m_total, 1), jnp.float32),    # per-row LSE
        ),
        grid_spec=pltpu.PrefetchScalarGridSpec(
            num_scalar_prefetch=0,
            # vocab tile OUTER (carries the online-LSE state -> sequential), m tile
            # INNER so the weight block index (0, j) is invariant over the inner axis:
            # the full weight is streamed from HBM exactly once per forward.
            grid=(nn, nm),
            in_specs=[
                pl.BlockSpec((tm_eff, d_model), lambda j, i: (i, 0)),
                pl.BlockSpec((d_model, tn_eff), lambda j, i: (0, j)),
                pl.BlockSpec((1, tn_eff), lambda j, i: (0, j)),
            ],
            out_specs=(
                pl.BlockSpec((tm_eff, tn_eff), lambda j, i: (i, j)),
                pl.BlockSpec((tm_eff, 1), lambda j, i: (i, 0)),
            ),
            scratch_shapes=[
                pltpu.VMEM((nm, tm_eff, 1), jnp.float32),  # running row max (full M)
                pltpu.VMEM((nm, tm_eff, 1), jnp.float32),  # running row sum-exp (full M)
            ],
        ),
        compiler_params=pltpu.CompilerParams(
            # Both axes sequential: the vocab axis carries the LSE state, and keeping
            # the m axis "arbitrary" (it is measured ~neutral on single-core chips)
            # avoids relying on non-leading parallel axes.  See v7x TODO above.
            dimension_semantics=("arbitrary", "arbitrary"),
            vmem_limit_bytes=vmem_limit,
        ),
    )(x_bf, w_bf, b2d)

    # Pass B: normalize the logits buffer in place (no matmul, no weight traffic).
    out = pl.pallas_call(
        _lse_fixup_kernel,
        out_shape=out_shape2d,
        grid_spec=pltpu.PrefetchScalarGridSpec(
            num_scalar_prefetch=0,
            grid=(nm, nn),
            in_specs=[
                pl.BlockSpec((tm_eff, tn_eff), lambda i, j: (i, j)),
                pl.BlockSpec((tm_eff, 1), lambda i, j: (i, 0)),
            ],
            out_specs=pl.BlockSpec((tm_eff, tn_eff), lambda i, j: (i, j)),
        ),
        input_output_aliases={0: 0},
        compiler_params=pltpu.CompilerParams(
            dimension_semantics=("parallel", "parallel"),
            vmem_limit_bytes=vmem_limit,
        ),
    )(logits_raw, lse)

    return out.reshape(*orig_shape[:-1], vocab)


# ----------------------------------------------------------------------------------
# Reference + tests
# ----------------------------------------------------------------------------------
def _reference(x, weight, bias):
    logits = jnp.einsum("...d,dv->...v", x, weight) + bias
    return jax.nn.log_softmax(logits, axis=-1)


if __name__ == "__main__":
    d_model = 32
    vocab = 256
    batch, seq = 2, 8

    key = jax.random.PRNGKey(0)
    kx, kw, kb, kx2 = jax.random.split(key, 4)

    # Deterministic init (mimics nn.Linear's uniform(-1/sqrt(d), 1/sqrt(d))).
    bound = 1.0 / (d_model ** 0.5)
    weight = jax.random.uniform(
        kw, (d_model, vocab), jnp.float32, minval=-bound, maxval=bound)
    bias = jax.random.uniform(
        kb, (vocab,), jnp.float32, minval=-bound, maxval=bound)
    x = jax.random.normal(kx, (batch, seq, d_model), jnp.float32)

    # Cast the weight to bf16 ONCE at init (avoids a per-call f32->bf16 weight stream).
    weight_bf = weight.astype(jnp.bfloat16)

    ref = _reference(x, weight, bias)

    TOL_F32 = 5e-2     # bf16 matmul operands; softmax math in f32
    TOL_BF16 = 1.5e-1  # + bf16 logit / log-prob storage

    def max_err(a, b):
        return float(jnp.max(jnp.abs(a.astype(jnp.float32) - b)))

    # 1) Default call: bf16 output, whole vocab in one tile (single-pass path).
    out1 = jax.block_until_ready(generator_forward(x, weight_bf, bias))
    assert out1.shape == (batch, seq, vocab), out1.shape
    assert out1.dtype == jnp.bfloat16, out1.dtype
    assert max_err(out1, ref) < TOL_BF16, max_err(out1, ref)

    # 2) Forced vocab tiling (pass A: logits + online LSE, pass B: fixup), f32 output.
    out2 = jax.block_until_ready(
        generator_forward(x, weight_bf, bias, tm=8, tn=128, out_dtype=jnp.float32))
    assert max_err(out2, ref) < TOL_F32, max_err(out2, ref)

    # 3) Forced vocab tiling with the default bf16 output.
    out3 = jax.block_until_ready(generator_forward(x, weight_bf, bias, tm=8, tn=128))
    assert max_err(out3, ref) < TOL_BF16, max_err(out3, ref)

    # 4) Ragged M (partial last m block; no host-side padding).
    x4 = jax.random.normal(kx2, (3, 5, d_model), jnp.float32)
    ref4 = _reference(x4, weight, bias)
    out4 = jax.block_until_ready(
        generator_forward(x4, weight_bf, bias, tm=8, tn=128, out_dtype=jnp.float32))
    assert out4.shape == (3, 5, vocab), out4.shape
    assert max_err(out4, ref4) < TOL_F32, max_err(out4, ref4)

    # 5) Ragged vocab (partial last vocab tile exercises the in-kernel mask).
    v2 = 200
    ref5 = _reference(x, weight[:, :v2], bias[:v2])
    out5 = jax.block_until_ready(
        generator_forward(x, weight_bf[:, :v2], bias[:v2],
                          tm=8, tn=128, out_dtype=jnp.float32))
    assert out5.shape == (batch, seq, v2), out5.shape
    assert max_err(out5, ref5) < TOL_F32, max_err(out5, ref5)

    print("KERNEL_OK")
</pallas_src>

<mosaic_0001>
module attributes {stable_mosaic.version = 11 : i64} {
  func.func @_generator_kernel_single(%arg0: i32, %arg1: memref<8x32xbf16, #tpu.memory_space<vmem>>, %arg2: memref<32x256xbf16, #tpu.memory_space<vmem>>, %arg3: memref<1x256xf32, #tpu.memory_space<vmem>>, %arg4: memref<8x256xbf16, #tpu.memory_space<vmem>>) attributes {dimension_semantics = [#tpu.dimension_semantics<parallel>], iteration_bounds = array<i64: 2>, scalar_prefetch = 0 : i64, scratch_operands = 0 : i64, tpu.core_type = #tpu.core_type<tc>, window_params = [{transform_indices = @transform_0, window_bounds = array<i64: 8, 32>}, {pipeline_mode = #tpu.pipeline_mode<synchronous>, transform_indices = @transform_1, window_bounds = array<i64: 32, 256>}, {pipeline_mode = #tpu.pipeline_mode<synchronous>, transform_indices = @transform_2, window_bounds = array<i64: 1, 256>}, {transform_indices = @transform_3, window_bounds = array<i64: 8, 256>}]} {
    %c0 = arith.constant 0 : index
    %c0_0 = arith.constant 0 : index
    %0 = vector.load %arg1[%c0, %c0_0] : memref<8x32xbf16, #tpu.memory_space<vmem>>, vector<8x32xbf16>
    %c0_1 = arith.constant 0 : index
    %c0_2 = arith.constant 0 : index
    %1 = vector.load %arg2[%c0_1, %c0_2] : memref<32x256xbf16, #tpu.memory_space<vmem>>, vector<32x256xbf16>
    %cst = arith.constant dense<0.000000e+00> : vector<8x256xf32>
    %2 = tpu.matmul %0, %1, %cst {dimension_numbers = #tpu.dot_dimension_numbers<[1], [0], [0], [1], [0, 0, 1, 1], [], []>} : vector<8x32xbf16>, vector<32x256xbf16>, vector<8x256xf32> -> vector<8x256xf32>
    %c0_3 = arith.constant 0 : index
    %c0_4 = arith.constant 0 : index
    %3 = vector.load %arg3[%c0_3, %c0_4] : memref<1x256xf32, #tpu.memory_space<vmem>>, vector<1x256xf32>
    %4 = vector.broadcast %3 : vector<1x256xf32> to vector<8x256xf32>
    %5 = arith.addf %2, %4 : vector<8x256xf32>
    %cst_5 = arith.constant dense<0xFF800000> : vector<8xf32>
    %6 = vector.multi_reduction <maximumf>, %5, %cst_5 [1] : vector<8x256xf32> to vector<8xf32>
    %7 = vector.shape_cast %6 : vector<8xf32> to vector<8x1xf32>
    %8 = vector.broadcast %7 : vector<8x1xf32> to vector<8x256xf32>
    %9 = arith.subf %5, %8 : vector<8x256xf32>
    %10 = math.exp %9 : vector<8x256xf32>
    %cst_6 = arith.constant dense<0.000000e+00> : vector<8xf32>
    %11 = vector.multi_reduction <add>, %10, %cst_6 [1] : vector<8x256xf32> to vector<8xf32>
    %12 = vector.shape_cast %11 : vector<8xf32> to vector<8x1xf32>
    %13 = math.log %12 : vector<8x1xf32>
    %14 = vector.broadcast %13 : vector<8x1xf32> to vector<8x256xf32>
    %15 = arith.subf %9, %14 : vector<8x256xf32>
    %16 = arith.truncf %15 : vector<8x256xf32> to vector<8x256xbf16>
    %c0_7 = arith.constant 0 : index
    %c0_8 = arith.constant 0 : index
    %17 = vector.load %arg4[%c0_7, %c0_8] : memref<8x256xbf16, #tpu.memory_space<vmem>>, vector<8x256xbf16>
    tpu.vector_store %arg4[%c0_7, %c0_8], %16 {strides = array<i32>} : memref<8x256xbf16, #tpu.memory_space<vmem>>, vector<8x256xbf16>,
    return
  }
  func.func @transform_0(%arg0: i32) -> (i32, i32) {
    %c0_i32 = arith.constant 0 : i32
    %c0_i32_0 = arith.constant 0 : i32
    return %arg0, %c0_i32 : i32, i32
  }
  func.func @transform_1(%arg0: i32) -> (i32, i32) {
    %c0_i32 = arith.constant 0 : i32
    %c0_i32_0 = arith.constant 0 : i32
    %c0_i32_1 = arith.constant 0 : i32
    return %c0_i32, %c0_i32_0 : i32, i32
  }
  func.func @transform_2(%arg0: i32) -> (i32, i32) {
    %c0_i32 = arith.constant 0 : i32
    %c0_i32_0 = arith.constant 0 : i32
    %c0_i32_1 = arith.constant 0 : i32
    return %c0_i32, %c0_i32_0 : i32, i32
  }
  func.func @transform_3(%arg0: i32) -> (i32, i32) {
    %c0_i32 = arith.constant 0 : i32
    %c0_i32_0 = arith.constant 0 : i32
    return %arg0, %c0_i32 : i32, i32
  }
}

</mosaic_0001>

<bundles_post_ra>
// kernel: generator_forward.1
= control target key start
LH: loop header
LB: loop body
LE: loop exit
PB: predicated region body
PF: predicated region fallthrough
CT: control target
= control target key end

     0   :  { %8 = vsyncpa [#allocation3], 0  ;;  %s686_s0 = inlined_call_operand.vmem [shape: bf16[16,32], index: 0, kind: input, shape index: {}]   ;;  %s687_s1 = inlined_call_operand.hbm [shape: bf16[32,256], index: 1, kind: input, shape index: {}]   ;;  %s688_s2 = inlined_call_operand.vmem [shape: f32[1,256], index: 2, kind: input, shape index: {}]   ;;  %s689_s3 = inlined_call_operand.hbm [shape: bf16[16,256], index: 3, kind: output, shape index: {}]  }
   0x1   :  { %9 = vsyncpa [#allocation4], 0 }
   0x2   :  { %11 = vsyncpa [#allocation4 + $0x1], 0  ;;  %s578_s12 = smov 0   ;;  %s580_s13 = smov 0  }
   0x3   :  { %s582_s14 = smov 0   ;;  %s584_s15 = smov 0  }
   0x4 LB: > { %s599_s16 = sadd.s32 4294967295, %s551_s15   ;;  %s375_s17 = sadd.s32 4294967294, %s551_s15   ;;  %s551_s15 = sphi %s584_s15, %s697_s15   ;;  %s547_s14 = sphi %s582_s14, %s696_s14   ;;  %s543_s13 = sphi %s580_s13, %s695_s13   ;;  %s539_s12 = sphi %s578_s12, %s694_s12  }
   0x5   : > { %s603_s18 = sadd.s32 1, %s551_s15   ;;  %s92_s19 = sadd.s32 1, %s547_s14 }
   0x6   : > { %s89_s20 = ssub.s32 %s551_s15, %s603_s18  ;;  %p102_p0 = scmp.ne.s32.totalorder %s547_s14, %s543_s13 }
   0x7   : > { %p90_p1 = scmp.eq.s32.totalorder %s89_s20, 0  ;;  %p103_p2 = scmp.eq.s32.totalorder %s599_s16, 1 }
   0x8   : > { %p108_p3 = scmp.ne.s32.totalorder %s543_s13, %s539_s12  ;;  %p109_p4 = scmp.eq.s32.totalorder %s375_s17, 1 }
   0x9   : > { %s614_s21 = scalar_select %p90_p1, %s547_s14, %s92_s19  }
   0xa   : > { %p616_p5 = por %p103_p2, %p102_p0  ;;  %p620_p6 = por %p109_p4, %p108_p3 }
   0xb   : > { %p376_p7 = scmp.ge.s32.totalorder %s551_s15, 1  ;;  %p116_p8 = scmp.lt.s32.totalorder %s551_s15, 3 }
   0xc   : > { %s691_s23 = scalar_select %p620_p6, 1, 0 }
   0xd   : > { %p410_p9 = scmp.eq.s32.totalorder %s599_s16, 0  ;;  %p627_p10 = pnand %p376_p7, %p116_p8 }
   0xe   : > { %s553_s25 = smov [#allocation2]  }
   0xf   : > { %s128_s26 = sshll.u32 %s553_s25, 4  ;;  %p402_p11 = pneg %p627_p10  ;;  %s129_s26 = int_to_ptr.vmem [resolvable:$true] %s128_s26 }
  0x10   : > { %s472_s27 = scalar_lea.vmem %s129_s26, 512  ;;  %p480_p3 = scmp.lt.s32.totalorder %s129_s26, %s129_s26 }
  0x11   : > { %p403_p12 = pnand %p410_p9, %p402_p11  ;;  %p473_p0 = scmp.ne.s32.totalorder %s129_s26, %s472_s27 }
  0x12   : > { %p481_p4 = scmp.lt.s32.totalorder %s472_s27, %s472_s27 }
  0x13   : > { %p463_p13 = pneg %p403_p12 }
  0x14   : > { %p482_p6 = por %p481_p4, %p480_p3 }
  0x15   : > { %p475_p1 = pnand %p473_p0, %p463_p13 }
  0x17   : > { %p476_p2 = pneg %p475_p1 }
  0x19   : > { %p483_p7 = pnand %p482_p6, %p476_p2 }
  0x1b   : > { %486 = shalt.err (!%p483_p7)
}
  0x1c   : > { %s554_s28 = smov 128   ;;  %s555_s29 = smov 8  }
  0x1d   : > { %405 = dma.hbm_to_vmem [thread:$0]  (!%p403_p12), %s687_s1, 512, %s129_s26, [#allocation3], %s554_s28, %s554_s28, %s555_s29  }
  0x1e   : > { %154 = sbr.rel (%p627_p10) target bundleno = 574 (0x23e), region = 32 }
  0x23   : > { %530 = dma.done.wait (%p410_p9), [#allocation3], 512  }
  0x24   : > { %532 = vsyncadd (%p410_p9), [#allocation3], 4294966784  ;;  %p177_p8 = scmp.lt.s32.totalorder %s599_s16, 1  ;;  %v556_v0 = vmov 0   ;;  %v449_v1 = vld [vmem:[#allocation2 + $0x14] ss:$8 sps:$4 sm:$0xff]   ;;  %v189_v6 = vlaneseq }
  0x25   : > { %255 = vmatprep.mubr.bf16.mxu0 %v556_v0  ;;  %v451_v2 = vld [vmem:[#allocation2 + $0x10] ss:$8 sps:$4 sm:$0xff]   ;;  %235 = vmatprep.subr.bf16.mxu0 %v449_v1  ;;  %v452_v3 = vld [vmem:[#allocation2 + $0x4] ss:$8 sps:$4 sm:$0xff]   ;;  %v454_v4 = vld [vmem:[#allocation2] ss:$8 sps:$4 sm:$0xff]  }
  0x26   : > { %s178_s5 = scalar_select %p177_p8, %s599_s16, 1  ;;  %236 = vmatpush1.bf16.msra.mxu0 %v451_v2  ;;  %vm219_vm0 = vcmask 261120   ;;  %v190_v7 = vshrl.u32 %v189_v6, 7  ;;  %v187_v10 = vld [vmem:[%s688_s2] sm:$0x3] }
  0x27   : > { %237 = vmatprep.subr.bf16.mxu0 %v452_v3  ;;  %s174_s17 = sand.u32 1, %s543_s13   ;;  %s395_s20 = sshll.u32 %s599_s16, 7 }
  0x28   : > { %s382_s6 = sshll.u32 %s178_s5, 2  ;;  %v191_v8 = vsub.s32 0, %v190_v7  ;;  %v195_v9 = vsub.s32 1, %v190_v7  ;;  %s381_s19 = sshll.u32 %s174_s17, 3 }
  0x29   : > { %s180_s9 = scalar_lea.vmem %s686_s0, %s382_s6  ;;  %s176_s24 = scalar_lea.vmem [#allocation5], %s381_s19 }
  0x2a   : > { %238 = vmatpush1.bf16.msra.mxu0 %v454_v4  ;;  %v182_v5 = vld [vmem:[%s180_s9] sm:$0xf]  ;;  %v192_v11 = vrot.slane %v187_v10, %v191_v8  ;;  %v196_v12 = vrot.slane %v187_v10, %v195_v9  ;;  %s304_s25 = sshll.u32 %s176_s24, 4  ;;  %s302_s28 = scalar_lea.hbm %s689_s3, %s395_s20  ;;  %s305_s25 = int_to_ptr.vmem [resolvable:$true] %s304_s25 }
  0x2b   : > { %s290_s29 = scalar_lea.sflag [#allocation4], %s174_s17  ;;  %s487_s30 = scalar_lea.vmem %s305_s25, 128 }
  0x2c   : > { %p488_p6 = scmp.ne.s32.totalorder %s305_s25, %s487_s30  ;;  %s557_s4 = smov [#allocation5]  }
  0x2d   : > { %387 = vmatmul.mubr.msk.bf16.vlgmr.msra.gmra.mxu0 %vm219_vm0, %v182_v5  ;;  %s491_s5 = sshll.u32 %s557_s4, 4  ;;  %s492_s5 = int_to_ptr.vmem [resolvable:$false] %s491_s5 }
  0x2e   : > { %p489_p9 = pnand %p488_p6, %p616_p5  ;;  %s493_s16 = scalar_lea.vmem %s492_s5, 256 }
  0x2f   : > { %p494_p11 = scmp.lt.s32.totalorder %s305_s25, %s492_s5  ;;  %p495_p12 = scmp.lt.s32.totalorder %s493_s16, %s487_s30 }
  0x30   : > { %p490_p10 = pneg %p489_p9 }
  0x31   : > { %p496_p13 = por %p495_p12, %p494_p11 }
  0x33   : > { %p497_p0 = pnand %p496_p13, %p490_p10 }
  0xed   : > { %v257_v13 = vpop.f32.mrf.mxu0 }
  0xee   : > { %v258_v15 = vadd.f32 %v257_v13, %v192_v11 }
  0xef   : > { %v259_v14 = vpop.f32.mrf.mxu0 }
  0xf0   : > { %v260_v16 = vadd.f32 %v259_v14, %v196_v12 }
  0xf1   : > { %v261_v17 = vpop.f32.mrf.mxu0 }
  0xf2   : > { %v264_v18 = vmax.f32 %v258_v15, %v260_v16 }
  0xf3   : > { %v262_v19 = vpop.f32.mrf.mxu0 }
  0xf4   : > { %265 = vmax.xlane.f32.xlu0 %v264_v18 }
 0x17d   : > { %v266_v20 = vpop.xlane.xlu0 %265 }
 0x17e   : > { %v267_v21 = vsub.f32 %v258_v15, %v266_v20  ;;  %v268_v22 = vsub.f32 %v260_v16, %v266_v20 }
 0x180   : > { %v269_v23 = vmul.f32 1.442695, %v267_v21  ;;  %v271_v24 = vmul.f32 1.442695, %v268_v22 }
 0x182   : > { %455 = vpow2.f32 %v269_v23 }
 0x183   : > { %457 = vpow2.f32 %v271_v24 }
 0x18f   : > { %v456_v25 = vpop.eup %455 }
 0x190   : > { %v458_v26 = vpop.eup %457 }
 0x191   : > { %v273_v27 = vadd.f32 %v458_v26, %v456_v25 }
 0x193   : > { %274 = vadd.xlane.f32.xlu0 %v273_v27 }
 0x21c   : > { %v275_v28 = vpop.xlane.xlu0 %274 }
 0x21d   : > { %459 = vlog2.f32 %v275_v28 }
 0x22a   : > { %v460_v29 = vpop.eup %459 }
 0x22b   : > { %v277_v30 = vmul.f32 0.6931472, %v460_v29 }
 0x22d   : > { %v278_v31 = vsub.f32 %v267_v21, %v277_v30  ;;  %v279_v32 = vsub.f32 %v268_v22, %v277_v30 }
 0x22f   : > { %v394_v33 = vpack.c.bf16 %v279_v32, %v278_v31 }
 0x231   : > { %288 = vst [vmem:[%s176_s24] sm:$0xff] %v394_v33 }
 0x232   : > { %500 = shalt.err (!%p497_p0)
}
 0x233   : > { %s501_s6 = scalar_lea.hbm %s302_s28, 128  ;;  %s505_s9 = scalar_lea.hbm %s689_s3, 256 }
 0x234   : > { %p502_p1 = scmp.ne.s32.totalorder %s302_s28, %s501_s6  ;;  %p506_p4 = scmp.lt.s32.totalorder %s302_s28, %s689_s3 }
 0x235   : > { %p507_p7 = scmp.lt.s32.totalorder %s505_s9, %s501_s6 }
 0x236   : > { %p503_p2 = pnand %p502_p1, %p616_p5 }
 0x237   : > { %p508_p8 = por %p507_p7, %p506_p4 }
 0x238   : > { %p504_p3 = pneg %p503_p2 }
 0x23a   : > { %p509_p6 = pnand %p508_p8, %p504_p3 }
 0x23c   : > { %512 = shalt.err (!%p509_p6)
}
 0x23d   : > { %400 = dma.vmem_to_hbm [thread:$0]  (%p616_p5), %s305_s25, 128, %s302_s28, %s290_s29  }
 0x23e PF: > { %p412_p9 = scmp.ge.s32.totalorder %s551_s15, 2  ;;  %s316_s17 = sand.u32 1, %s539_s12  }
 0x23f   : > { %p693_p10 = scmp.ne.s32.totalorder %s691_s23, 0  ;;  %s317_s19 = scalar_lea.sflag [#allocation4], %s316_s17 }
 0x241   : > { %p407_p11 = pnand %p412_p9, %p693_p10 }
 0x243   : > { %p408_p12 = pneg %p407_p11 }
 0x245   : > { %534 = dma.done.wait (%p408_p12), %s317_s19, 128  }
 0x246   : > { %536 = vsyncadd (%p408_p12), %s317_s19, 4294967168  ;;  %p14_p13 = scmp.ge.s32.totalorder %s603_s18, 4   ;;  %s694_s12 = smov %s543_s13 }
 0x247   : > { %s695_s13 = smov %s547_s14  ;;  %s696_s14 = smov %s614_s21 }
 0x248   : > { %s697_s15 = smov %s603_s18  ;;  %16 = sbr.rel (!%p14_p13) target bundleno = 4 (0x4), region = 72 }
 0x24d   :  { %322 = vsyncpa [#allocation3], 1 }
 0x24e   :  { %324 = vsyncpa [#allocation3 + $0x1], 1 }
 0x24f   :  { %325 = vsyncpa [#allocation4], 1 }
 0x250   :  { %327 = vsyncpa [#allocation4 + $0x1], 1 }

</bundles_post_ra>
